<compile_context>
chip_gen: v7x
topology: tpu7x:2x2x1
jax: 0.10.0
libtpu: 0.0.40
codegen_flags: <defaults>
</compile_context>

<pallas_src>
import jax
import jax.numpy as jnp
import numpy as np
from jax.experimental import pallas as pl
from jax.experimental.pallas import tpu as pltpu

LN_EPS = 1e-5  # PyTorch nn.LayerNorm default


def _layernorm(x, gamma, beta):
    # Single-pass mean/variance: sum(x) and sum(x*x) can issue back-to-back
    # (no serial dependence on the mean), halving the LN reduction depth.
    # x: (M, D) f32; gamma/beta: (1, D) f32; normalize over last axis.
    x = x.astype(jnp.float32)
    inv_d = 1.0 / x.shape[-1]
    s1 = jnp.sum(x, axis=-1, keepdims=True)
    s2 = jnp.sum(x * x, axis=-1, keepdims=True)
    mu = s1 * inv_d
    # max(.., 0): guards tiny negative variance from cancellation; also note
    # padded batch rows are all-zero -> var=0 -> rsqrt(eps): finite, and those
    # rows are sliced off in the wrapper, so this is benign.
    var = jnp.maximum(s2 * inv_d - mu * mu, 0.0)
    return (x - mu) * jax.lax.rsqrt(var + LN_EPS) * gamma + beta


def mixer_block_kernel(
    x_ref,            # (TB, P, D)
    g1_ref, b1_ref,   # token-mix LayerNorm: (1, D), (1, D)   f32
    wt1_ref, bt1_ref, # token MLP layer 1:   (P, T), (1, T)   (weights f32/bf16)
    wt2_ref, bt2_ref, # token MLP layer 2:   (T, P), (1, P)
    g2_ref, b2_ref,   # channel-mix LayerNorm: (1, D), (1, D) f32
    wc1_ref, bc1_ref, # channel MLP layer 1: (D, C), (1, C)
    wc2_ref, bc2_ref, # channel MLP layer 2: (C, D), (1, D)
    o_ref,            # (TB, P, D)
):
    tb, p, d = x_ref.shape
    mm_dtype = wt1_ref.dtype  # bf16 when the wrapper casts weights, else f32

    # Flatten batch*patch rows; these reshapes only merge/split leading dims
    # (last dim unchanged), which are layout-preserving on TPU.
    x = x_ref[...].reshape(tb * p, d).astype(jnp.float32)            # (TB*P, D)

    # ---- token mixing: LN over D, MLP over P ----
    y = _layernorm(x, g1_ref[...], b1_ref[...])                      # (TB*P, D) f32
    # Cast once for the whole stage, then do the b p d -> b d p relayout in
    # the (narrow) matmul dtype; fold TB into the matmul M dimension.
    y_mm = y.astype(mm_dtype)
    yt = jnp.swapaxes(y_mm.reshape(tb, p, d), 1, 2).reshape(tb * d, p)   # (TB*D, P)
    h = jnp.dot(yt, wt1_ref[...],
                preferred_element_type=jnp.float32) + bt1_ref[...]       # (TB*D, T) f32
    h = jnp.maximum(h, 0.0).astype(mm_dtype)
    tok_t = jnp.dot(h, wt2_ref[...],
                    preferred_element_type=jnp.float32) + bt2_ref[...]   # (TB*D, P) f32
    # Keep the inverse relayout narrow as well.
    tok_t = tok_t.astype(mm_dtype)
    tok = jnp.swapaxes(tok_t.reshape(tb, d, p), 1, 2).reshape(tb * p, d)  # (TB*P, D)
    x1 = x + tok.astype(jnp.float32)                                      # residual, f32

    # ---- channel mixing: LN over D, MLP over D ----
    y2 = _layernorm(x1, g2_ref[...], b2_ref[...]).astype(mm_dtype)        # (TB*P, D)
    z = jnp.dot(y2, wc1_ref[...],
                preferred_element_type=jnp.float32) + bc1_ref[...]        # (TB*P, C) f32
    z = jnp.maximum(z, 0.0).astype(mm_dtype)
    ch = jnp.dot(z, wc2_ref[...],
                 preferred_element_type=jnp.float32) + bc2_ref[...]       # (TB*P, D) f32

    o_ref[...] = (x1 + ch).reshape(tb, p, d).astype(o_ref.dtype)


def _vmem_limit_bytes():
    """Generation-aware scoped-VMEM request: ~0.75x physical, capped at 100 MiB."""
    phys = 64 * 1024 * 1024  # conservative default = v7x per-core physical VMEM
    try:
        info = pltpu.get_tpu_info()
        phys = int(getattr(info, "vmem_capacity_bytes", phys))
    except Exception:
        pass
    return int(min(int(phys * 0.75), 100 * 1024 * 1024))


def _auto_block_b(P, D, T, C, x_itemsize, w_itemsize, vmem_limit):
    """Pick TB so that double-buffered I/O blocks + live intermediates sit at
    roughly 55% of the scoped VMEM limit (generous per-element estimate)."""
    per_elem = (
        4 * P * D * x_itemsize                # in + out blocks, double-buffered
        + 4 * (8 * P * D + D * T + P * C)     # f32 temporaries (x, LN, residuals, h, z)
        + 2 * (2 * P * D + D * T + P * C)     # bf16 staging copies
    )
    fixed = (
        w_itemsize * 2 * (P * T + D * C)      # the four weight matrices
        + 4 * (4 * D + T + 2 * P + C)         # LN params + biases (f32)
        + (2 << 20)                           # compiler-internal scratch headroom
    )
    budget = int(0.55 * vmem_limit) - fixed
    tb = budget // max(per_elem, 1)
    return int(max(8, min(tb, 1024)))


def mixer_block(x, params, *, block_b=None, use_bf16_matmul=True):
    B, P, D = x.shape
    T = params["wt1"].shape[1]
    C = params["wc1"].shape[1]

    vmem_limit = _vmem_limit_bytes()
    w_dtype = jnp.bfloat16 if use_bf16_matmul else params["wt1"].dtype
    w_itemsize = jnp.dtype(w_dtype).itemsize

    if block_b is None:
        tb = _auto_block_b(P, D, T, C, jnp.dtype(x.dtype).itemsize,
                           w_itemsize, vmem_limit)
    else:
        tb = int(block_b)
    tb = max(1, min(tb, B))
    # Keep at least 2 grid steps when possible: enables DMA/compute overlap and
    # lets the "parallel" batch axis split across v7x's two TensorCores.
    if B > 1 and pl.cdiv(B, tb) < 2:
        tb = pl.cdiv(B, 2)

    b_pad = pl.cdiv(B, tb) * tb
    # Padded rows are all-zero; they pass through LN with var=0 (finite output
    # via eps) and are sliced off below — do not reuse them downstream.
    x_in = x if b_pad == B else jnp.pad(x, ((0, b_pad - B), (0, 0), (0, 0)))

    wt1 = params["wt1"].astype(w_dtype)
    wt2 = params["wt2"].astype(w_dtype)
    wc1 = params["wc1"].astype(w_dtype)
    wc2 = params["wc2"].astype(w_dtype)
    # bt2 is the per-patch bias of the second token-MLP Linear; present it as
    # (1, P) so the kernel adds it with a plain lane broadcast.
    bt2 = params["bt2"].reshape(1, P).astype(jnp.float32)

    args = (
        x_in,
        params["g1"], params["b1"],
        wt1, params["bt1"],
        wt2, bt2,
        params["g2"], params["b2"],
        wc1, params["bc1"],
        wc2, params["bc2"],
    )

    def const_spec(shape):
        # Constant index_map; default buffering (param blocks are tiny).
        return pl.BlockSpec(shape, lambda i, _n=len(shape): (0,) * _n)

    in_specs = [
        pl.BlockSpec((tb, P, D), lambda i: (i, 0, 0)),   # x
        const_spec((1, D)), const_spec((1, D)),          # g1, b1
        const_spec((P, T)), const_spec((1, T)),          # wt1, bt1
        const_spec((T, P)), const_spec((1, P)),          # wt2, bt2
        const_spec((1, D)), const_spec((1, D)),          # g2, b2
        const_spec((D, C)), const_spec((1, C)),          # wc1, bc1
        const_spec((C, D)), const_spec((1, D)),          # wc2, bc2
    ]

    out = pl.pallas_call(
        mixer_block_kernel,
        out_shape=jax.ShapeDtypeStruct((b_pad, P, D), x.dtype),
        grid_spec=pltpu.PrefetchScalarGridSpec(
            num_scalar_prefetch=0,
            grid=(b_pad // tb,),
            in_specs=in_specs,
            out_specs=pl.BlockSpec((tb, P, D), lambda i: (i, 0, 0)),
        ),
        compiler_params=pltpu.CompilerParams(
            dimension_semantics=("parallel",),
            vmem_limit_bytes=vmem_limit,
        ),
    )(*args)
    return out if b_pad == B else out[:B]


def mixer_block_ref(x, p):
    """Pure-JAX (f32) reference mirroring the PyTorch module."""
    def ln(v, g, b):
        mu = jnp.mean(v, axis=-1, keepdims=True)
        var = jnp.mean((v - mu) ** 2, axis=-1, keepdims=True)
        return (v - mu) / jnp.sqrt(var + LN_EPS) * g + b

    # token mix
    y = ln(x, p["g1"], p["b1"])                                # (B, P, D)
    yt = jnp.swapaxes(y, 1, 2)                                 # (B, D, P)
    h = jnp.maximum(yt @ p["wt1"] + p["bt1"][0], 0.0)          # (B, D, T)
    tok = jnp.swapaxes(h @ p["wt2"] + p["bt2"][0], 1, 2)       # (B, P, D)
    x1 = x + tok
    # channel mix
    y2 = ln(x1, p["g2"], p["b2"])
    z = jnp.maximum(y2 @ p["wc1"] + p["bc1"][0], 0.0)
    ch = z @ p["wc2"] + p["bc2"][0]
    return x1 + ch


def make_params(key, dim, num_patch, token_dim, channel_dim):
    ks = jax.random.split(key, 10)
    scale = 0.02
    return {
        "g1": 1.0 + 0.1 * jax.random.normal(ks[0], (1, dim), jnp.float32),
        "b1": 0.1 * jax.random.normal(ks[1], (1, dim), jnp.float32),
        "wt1": scale * jax.random.normal(ks[2], (num_patch, token_dim), jnp.float32),
        "bt1": 0.1 * jax.random.normal(ks[3], (1, token_dim), jnp.float32),
        "wt2": scale * jax.random.normal(ks[4], (token_dim, num_patch), jnp.float32),
        "bt2": 0.1 * jax.random.normal(ks[5], (1, num_patch), jnp.float32),
        "g2": 1.0 + 0.1 * jax.random.normal(ks[6], (1, dim), jnp.float32),
        "b2": 0.1 * jax.random.normal(ks[7], (1, dim), jnp.float32),
        "wc1": scale * jax.random.normal(ks[8], (dim, channel_dim), jnp.float32),
        "bc1": 0.1 * jax.random.normal(ks[9], (1, channel_dim), jnp.float32),
        "wc2": scale * jax.random.normal(ks[2], (channel_dim, dim), jnp.float32),
        "bc2": 0.1 * jax.random.normal(ks[4], (1, dim), jnp.float32),
    }


if __name__ == "__main__":
    B, P, D = 6, 16, 32          # batch, num_patch, dim
    T, C = 64, 128               # token_dim, channel_dim

    key = jax.random.PRNGKey(0)
    kx, kp = jax.random.split(key)
    x = jax.random.normal(kx, (B, P, D), jnp.float32)
    params = make_params(kp, D, P, T, C)

    ref = jax.block_until_ready(mixer_block_ref(x, params))

    # Auto-TB, f32 matmul path (exact-ish); B=6 -> TB=3, grid=2 (no padding).
    out_f32 = jax.block_until_ready(
        mixer_block(x, params, use_bf16_matmul=False))
    np.testing.assert_allclose(np.asarray(out_f32), np.asarray(ref),
                               rtol=1e-4, atol=1e-4)

    # Explicit small block: exercises batch padding (6 -> 8) + 2 grid steps.
    out_blk = jax.block_until_ready(
        mixer_block(x, params, block_b=4, use_bf16_matmul=False))
    np.testing.assert_allclose(np.asarray(out_blk), np.asarray(ref),
                               rtol=1e-4, atol=1e-4)

    # bf16-operand MXU path (default): f32 accumulation, looser tolerance.
    # NOTE: bf16 weights/activations deviate from the f32 PyTorch reference at
    # ~1e-2 relative — an explicit precision/perf trade-off.
    out_bf16 = jax.block_until_ready(mixer_block(x, params))
    np.testing.assert_allclose(np.asarray(out_bf16), np.asarray(ref),
                               rtol=1e-2, atol=1e-2)

    print("KERNEL_OK")
</pallas_src>

<mosaic_0001>
module attributes {stable_mosaic.version = 11 : i64} {
  func.func @mixer_block_kernel(%arg0: i32, %arg1: memref<3x16x32xf32, #tpu.memory_space<vmem>>, %arg2: memref<1x32xf32, #tpu.memory_space<vmem>>, %arg3: memref<1x32xf32, #tpu.memory_space<vmem>>, %arg4: memref<16x64xf32, #tpu.memory_space<vmem>>, %arg5: memref<1x64xf32, #tpu.memory_space<vmem>>, %arg6: memref<64x16xf32, #tpu.memory_space<vmem>>, %arg7: memref<1x16xf32, #tpu.memory_space<vmem>>, %arg8: memref<1x32xf32, #tpu.memory_space<vmem>>, %arg9: memref<1x32xf32, #tpu.memory_space<vmem>>, %arg10: memref<32x128xf32, #tpu.memory_space<vmem>>, %arg11: memref<1x128xf32, #tpu.memory_space<vmem>>, %arg12: memref<128x32xf32, #tpu.memory_space<vmem>>, %arg13: memref<1x32xf32, #tpu.memory_space<vmem>>, %arg14: memref<3x16x32xf32, #tpu.memory_space<vmem>>) attributes {dimension_semantics = [#tpu.dimension_semantics<parallel>], iteration_bounds = array<i64: 2>, scalar_prefetch = 0 : i64, scratch_operands = 0 : i64, tpu.core_type = #tpu.core_type<tc>, window_params = [{transform_indices = @transform_0, window_bounds = array<i64: 3, 16, 32>}, {pipeline_mode = #tpu.pipeline_mode<synchronous>, transform_indices = @transform_1, window_bounds = array<i64: 1, 32>}, {pipeline_mode = #tpu.pipeline_mode<synchronous>, transform_indices = @transform_2, window_bounds = array<i64: 1, 32>}, {pipeline_mode = #tpu.pipeline_mode<synchronous>, transform_indices = @transform_3, window_bounds = array<i64: 16, 64>}, {pipeline_mode = #tpu.pipeline_mode<synchronous>, transform_indices = @transform_4, window_bounds = array<i64: 1, 64>}, {pipeline_mode = #tpu.pipeline_mode<synchronous>, transform_indices = @transform_5, window_bounds = array<i64: 64, 16>}, {pipeline_mode = #tpu.pipeline_mode<synchronous>, transform_indices = @transform_6, window_bounds = array<i64: 1, 16>}, {pipeline_mode = #tpu.pipeline_mode<synchronous>, transform_indices = @transform_7, window_bounds = array<i64: 1, 32>}, {pipeline_mode = #tpu.pipeline_mode<synchronous>, transform_indices = @transform_8, window_bounds = array<i64: 1, 32>}, {pipeline_mode = #tpu.pipeline_mode<synchronous>, transform_indices = @transform_9, window_bounds = array<i64: 32, 128>}, {pipeline_mode = #tpu.pipeline_mode<synchronous>, transform_indices = @transform_10, window_bounds = array<i64: 1, 128>}, {pipeline_mode = #tpu.pipeline_mode<synchronous>, transform_indices = @transform_11, window_bounds = array<i64: 128, 32>}, {pipeline_mode = #tpu.pipeline_mode<synchronous>, transform_indices = @transform_12, window_bounds = array<i64: 1, 32>}, {transform_indices = @transform_13, window_bounds = array<i64: 3, 16, 32>}]} {
    %c0 = arith.constant 0 : index
    %c0_0 = arith.constant 0 : index
    %c0_1 = arith.constant 0 : index
    %0 = vector.load %arg1[%c0, %c0_0, %c0_1] : memref<3x16x32xf32, #tpu.memory_space<vmem>>, vector<3x16x32xf32>
    %1 = vector.shape_cast %0 : vector<3x16x32xf32> to vector<48x32xf32>
    %c0_2 = arith.constant 0 : index
    %c0_3 = arith.constant 0 : index
    %2 = vector.load %arg2[%c0_2, %c0_3] : memref<1x32xf32, #tpu.memory_space<vmem>>, vector<1x32xf32>
    %c0_4 = arith.constant 0 : index
    %c0_5 = arith.constant 0 : index
    %3 = vector.load %arg3[%c0_4, %c0_5] : memref<1x32xf32, #tpu.memory_space<vmem>>, vector<1x32xf32>
    %cst = arith.constant dense<0.000000e+00> : vector<48xf32>
    %4 = vector.multi_reduction <add>, %1, %cst [1] : vector<48x32xf32> to vector<48xf32>
    %5 = vector.shape_cast %4 : vector<48xf32> to vector<48x1xf32>
    %6 = arith.mulf %1, %1 : vector<48x32xf32>
    %cst_6 = arith.constant dense<0.000000e+00> : vector<48xf32>
    %7 = vector.multi_reduction <add>, %6, %cst_6 [1] : vector<48x32xf32> to vector<48xf32>
    %8 = vector.shape_cast %7 : vector<48xf32> to vector<48x1xf32>
    %cst_7 = arith.constant 3.125000e-02 : f32
    %9 = vector.broadcast %cst_7 : f32 to vector<48x1xf32>
    %10 = arith.mulf %5, %9 : vector<48x1xf32>
    %cst_8 = arith.constant 3.125000e-02 : f32
    %11 = vector.broadcast %cst_8 : f32 to vector<48x1xf32>
    %12 = arith.mulf %8, %11 : vector<48x1xf32>
    %13 = arith.mulf %10, %10 : vector<48x1xf32>
    %14 = arith.subf %12, %13 : vector<48x1xf32>
    %cst_9 = arith.constant 0.000000e+00 : f32
    %15 = vector.broadcast %cst_9 : f32 to vector<48x1xf32>
    %16 = arith.maximumf %14, %15 : vector<48x1xf32>
    %17 = vector.broadcast %10 : vector<48x1xf32> to vector<48x32xf32>
    %18 = arith.subf %1, %17 : vector<48x32xf32>
    %cst_10 = arith.constant 9.99999974E-6 : f32
    %19 = vector.broadcast %cst_10 : f32 to vector<48x1xf32>
    %20 = arith.addf %16, %19 : vector<48x1xf32>
    %21 = math.rsqrt %20 : vector<48x1xf32>
    %22 = vector.broadcast %21 : vector<48x1xf32> to vector<48x32xf32>
    %23 = arith.mulf %18, %22 : vector<48x32xf32>
    %24 = vector.broadcast %2 : vector<1x32xf32> to vector<48x32xf32>
    %25 = arith.mulf %23, %24 : vector<48x32xf32>
    %26 = vector.broadcast %3 : vector<1x32xf32> to vector<48x32xf32>
    %27 = arith.addf %25, %26 : vector<48x32xf32>
    %28 = vector.shape_cast %27 : vector<48x32xf32> to vector<3x16x32xf32>
    %29 = tpu.transpose %28, [0, 2, 1] : vector<3x16x32xf32> -> vector<3x32x16xf32>
    %30 = vector.shape_cast %29 : vector<3x32x16xf32> to vector<96x16xf32>
    %c0_11 = arith.constant 0 : index
    %c0_12 = arith.constant 0 : index
    %31 = vector.load %arg4[%c0_11, %c0_12] : memref<16x64xf32, #tpu.memory_space<vmem>>, vector<16x64xf32>
    %cst_13 = arith.constant dense<0.000000e+00> : vector<96x64xf32>
    %32 = tpu.matmul %30, %31, %cst_13 {dimension_numbers = #tpu.dot_dimension_numbers<[1], [0], [0], [1], [0, 0, 1, 1], [], []>} : vector<96x16xf32>, vector<16x64xf32>, vector<96x64xf32> -> vector<96x64xf32>
    %c0_14 = arith.constant 0 : index
    %c0_15 = arith.constant 0 : index
    %33 = vector.load %arg5[%c0_14, %c0_15] : memref<1x64xf32, #tpu.memory_space<vmem>>, vector<1x64xf32>
    %34 = vector.broadcast %33 : vector<1x64xf32> to vector<96x64xf32>
    %35 = arith.addf %32, %34 : vector<96x64xf32>
    %cst_16 = arith.constant 0.000000e+00 : f32
    %36 = vector.broadcast %cst_16 : f32 to vector<96x64xf32>
    %37 = arith.maximumf %35, %36 : vector<96x64xf32>
    %c0_17 = arith.constant 0 : index
    %c0_18 = arith.constant 0 : index
    %38 = vector.load %arg6[%c0_17, %c0_18] : memref<64x16xf32, #tpu.memory_space<vmem>>, vector<64x16xf32>
    %cst_19 = arith.constant dense<0.000000e+00> : vector<96x16xf32>
    %39 = tpu.matmul %37, %38, %cst_19 {dimension_numbers = #tpu.dot_dimension_numbers<[1], [0], [0], [1], [0, 0, 1, 1], [], []>} : vector<96x64xf32>, vector<64x16xf32>, vector<96x16xf32> -> vector<96x16xf32>
    %c0_20 = arith.constant 0 : index
    %c0_21 = arith.constant 0 : index
    %40 = vector.load %arg7[%c0_20, %c0_21] : memref<1x16xf32, #tpu.memory_space<vmem>>, vector<1x16xf32>
    %41 = vector.broadcast %40 : vector<1x16xf32> to vector<96x16xf32>
    %42 = arith.addf %39, %41 : vector<96x16xf32>
    %43 = vector.shape_cast %42 : vector<96x16xf32> to vector<3x32x16xf32>
    %44 = tpu.transpose %43, [0, 2, 1] : vector<3x32x16xf32> -> vector<3x16x32xf32>
    %45 = vector.shape_cast %44 : vector<3x16x32xf32> to vector<48x32xf32>
    %46 = arith.addf %1, %45 : vector<48x32xf32>
    %c0_22 = arith.constant 0 : index
    %c0_23 = arith.constant 0 : index
    %47 = vector.load %arg8[%c0_22, %c0_23] : memref<1x32xf32, #tpu.memory_space<vmem>>, vector<1x32xf32>
    %c0_24 = arith.constant 0 : index
    %c0_25 = arith.constant 0 : index
    %48 = vector.load %arg9[%c0_24, %c0_25] : memref<1x32xf32, #tpu.memory_space<vmem>>, vector<1x32xf32>
    %cst_26 = arith.constant dense<0.000000e+00> : vector<48xf32>
    %49 = vector.multi_reduction <add>, %46, %cst_26 [1] : vector<48x32xf32> to vector<48xf32>
    %50 = vector.shape_cast %49 : vector<48xf32> to vector<48x1xf32>
    %51 = arith.mulf %46, %46 : vector<48x32xf32>
    %cst_27 = arith.constant dense<0.000000e+00> : vector<48xf32>
    %52 = vector.multi_reduction <add>, %51, %cst_27 [1] : vector<48x32xf32> to vector<48xf32>
    %53 = vector.shape_cast %52 : vector<48xf32> to vector<48x1xf32>
    %cst_28 = arith.constant 3.125000e-02 : f32
    %54 = vector.broadcast %cst_28 : f32 to vector<48x1xf32>
    %55 = arith.mulf %50, %54 : vector<48x1xf32>
    %cst_29 = arith.constant 3.125000e-02 : f32
    %56 = vector.broadcast %cst_29 : f32 to vector<48x1xf32>
    %57 = arith.mulf %53, %56 : vector<48x1xf32>
    %58 = arith.mulf %55, %55 : vector<48x1xf32>
    %59 = arith.subf %57, %58 : vector<48x1xf32>
    %cst_30 = arith.constant 0.000000e+00 : f32
    %60 = vector.broadcast %cst_30 : f32 to vector<48x1xf32>
    %61 = arith.maximumf %59, %60 : vector<48x1xf32>
    %62 = vector.broadcast %55 : vector<48x1xf32> to vector<48x32xf32>
    %63 = arith.subf %46, %62 : vector<48x32xf32>
    %cst_31 = arith.constant 9.99999974E-6 : f32
    %64 = vector.broadcast %cst_31 : f32 to vector<48x1xf32>
    %65 = arith.addf %61, %64 : vector<48x1xf32>
    %66 = math.rsqrt %65 : vector<48x1xf32>
    %67 = vector.broadcast %66 : vector<48x1xf32> to vector<48x32xf32>
    %68 = arith.mulf %63, %67 : vector<48x32xf32>
    %69 = vector.broadcast %47 : vector<1x32xf32> to vector<48x32xf32>
    %70 = arith.mulf %68, %69 : vector<48x32xf32>
    %71 = vector.broadcast %48 : vector<1x32xf32> to vector<48x32xf32>
    %72 = arith.addf %70, %71 : vector<48x32xf32>
    %c0_32 = arith.constant 0 : index
    %c0_33 = arith.constant 0 : index
    %73 = vector.load %arg10[%c0_32, %c0_33] : memref<32x128xf32, #tpu.memory_space<vmem>>, vector<32x128xf32>
    %cst_34 = arith.constant dense<0.000000e+00> : vector<48x128xf32>
    %74 = tpu.matmul %72, %73, %cst_34 {dimension_numbers = #tpu.dot_dimension_numbers<[1], [0], [0], [1], [0, 0, 1, 1], [], []>} : vector<48x32xf32>, vector<32x128xf32>, vector<48x128xf32> -> vector<48x128xf32>
    %c0_35 = arith.constant 0 : index
    %c0_36 = arith.constant 0 : index
    %75 = vector.load %arg11[%c0_35, %c0_36] : memref<1x128xf32, #tpu.memory_space<vmem>>, vector<1x128xf32>
    %76 = vector.broadcast %75 : vector<1x128xf32> to vector<48x128xf32>
    %77 = arith.addf %74, %76 : vector<48x128xf32>
    %cst_37 = arith.constant 0.000000e+00 : f32
    %78 = vector.broadcast %cst_37 : f32 to vector<48x128xf32>
    %79 = arith.maximumf %77, %78 : vector<48x128xf32>
    %c0_38 = arith.constant 0 : index
    %c0_39 = arith.constant 0 : index
    %80 = vector.load %arg12[%c0_38, %c0_39] : memref<128x32xf32, #tpu.memory_space<vmem>>, vector<128x32xf32>
    %cst_40 = arith.constant dense<0.000000e+00> : vector<48x32xf32>
    %81 = tpu.matmul %79, %80, %cst_40 {dimension_numbers = #tpu.dot_dimension_numbers<[1], [0], [0], [1], [0, 0, 1, 1], [], []>} : vector<48x128xf32>, vector<128x32xf32>, vector<48x32xf32> -> vector<48x32xf32>
    %c0_41 = arith.constant 0 : index
    %c0_42 = arith.constant 0 : index
    %82 = vector.load %arg13[%c0_41, %c0_42] : memref<1x32xf32, #tpu.memory_space<vmem>>, vector<1x32xf32>
    %83 = vector.broadcast %82 : vector<1x32xf32> to vector<48x32xf32>
    %84 = arith.addf %81, %83 : vector<48x32xf32>
    %85 = arith.addf %46, %84 : vector<48x32xf32>
    %86 = vector.shape_cast %85 : vector<48x32xf32> to vector<3x16x32xf32>
    %c0_43 = arith.constant 0 : index
    %c0_44 = arith.constant 0 : index
    %c0_45 = arith.constant 0 : index
    %87 = vector.load %arg14[%c0_43, %c0_44, %c0_45] : memref<3x16x32xf32, #tpu.memory_space<vmem>>, vector<3x16x32xf32>
    tpu.vector_store %arg14[%c0_43, %c0_44, %c0_45], %86 {strides = array<i32>} : memref<3x16x32xf32, #tpu.memory_space<vmem>>, vector<3x16x32xf32>,
    return
  }
  func.func @transform_0(%arg0: i32) -> (i32, i32, i32) {
    %c0_i32 = arith.constant 0 : i32
    %c0_i32_0 = arith.constant 0 : i32
    %c0_i32_1 = arith.constant 0 : i32
    return %arg0, %c0_i32, %c0_i32_0 : i32, i32, i32
  }
  func.func @transform_1(%arg0: i32) -> (i32, i32) {
    %c0_i32 = arith.constant 0 : i32
    %c0_i32_0 = arith.constant 0 : i32
    %c0_i32_1 = arith.constant 0 : i32
    return %c0_i32, %c0_i32_0 : i32, i32
  }
  func.func @transform_2(%arg0: i32) -> (i32, i32) {
    %c0_i32 = arith.constant 0 : i32
    %c0_i32_0 = arith.constant 0 : i32
    %c0_i32_1 = arith.constant 0 : i32
    return %c0_i32, %c0_i32_0 : i32, i32
  }
  func.func @transform_3(%arg0: i32) -> (i32, i32) {
    %c0_i32 = arith.constant 0 : i32
    %c0_i32_0 = arith.constant 0 : i32
    %c0_i32_1 = arith.constant 0 : i32
    return %c0_i32, %c0_i32_0 : i32, i32
  }
  func.func @transform_4(%arg0: i32) -> (i32, i32) {
    %c0_i32 = arith.constant 0 : i32
    %c0_i32_0 = arith.constant 0 : i32
    %c0_i32_1 = arith.constant 0 : i32
    return %c0_i32, %c0_i32_0 : i32, i32
  }
  func.func @transform_5(%arg0: i32) -> (i32, i32) {
    %c0_i32 = arith.constant 0 : i32
    %c0_i32_0 = arith.constant 0 : i32
    %c0_i32_1 = arith.constant 0 : i32
    return %c0_i32, %c0_i32_0 : i32, i32
  }
  func.func @transform_6(%arg0: i32) -> (i32, i32) {
    %c0_i32 = arith.constant 0 : i32
    %c0_i32_0 = arith.constant 0 : i32
    %c0_i32_1 = arith.constant 0 : i32
    return %c0_i32, %c0_i32_0 : i32, i32
  }
  func.func @transform_7(%arg0: i32) -> (i32, i32) {
    %c0_i32 = arith.constant 0 : i32
    %c0_i32_0 = arith.constant 0 : i32
    %c0_i32_1 = arith.constant 0 : i32
    return %c0_i32, %c0_i32_0 : i32, i32
  }
  func.func @transform_8(%arg0: i32) -> (i32, i32) {
    %c0_i32 = arith.constant 0 : i32
    %c0_i32_0 = arith.constant 0 : i32
    %c0_i32_1 = arith.constant 0 : i32
    return %c0_i32, %c0_i32_0 : i32, i32
  }
  func.func @transform_9(%arg0: i32) -> (i32, i32) {
    %c0_i32 = arith.constant 0 : i32
    %c0_i32_0 = arith.constant 0 : i32
    %c0_i32_1 = arith.constant 0 : i32
    return %c0_i32, %c0_i32_0 : i32, i32
  }
  func.func @transform_10(%arg0: i32) -> (i32, i32) {
    %c0_i32 = arith.constant 0 : i32
    %c0_i32_0 = arith.constant 0 : i32
    %c0_i32_1 = arith.constant 0 : i32
    return %c0_i32, %c0_i32_0 : i32, i32
  }
  func.func @transform_11(%arg0: i32) -> (i32, i32) {
    %c0_i32 = arith.constant 0 : i32
    %c0_i32_0 = arith.constant 0 : i32
    %c0_i32_1 = arith.constant 0 : i32
    return %c0_i32, %c0_i32_0 : i32, i32
  }
  func.func @transform_12(%arg0: i32) -> (i32, i32) {
    %c0_i32 = arith.constant 0 : i32
    %c0_i32_0 = arith.constant 0 : i32
    %c0_i32_1 = arith.constant 0 : i32
    return %c0_i32, %c0_i32_0 : i32, i32
  }
  func.func @transform_13(%arg0: i32) -> (i32, i32, i32) {
    %c0_i32 = arith.constant 0 : i32
    %c0_i32_0 = arith.constant 0 : i32
    %c0_i32_1 = arith.constant 0 : i32
    return %arg0, %c0_i32, %c0_i32_0 : i32, i32, i32
  }
}

</mosaic_0001>

<bundles_post_ra>
// kernel: tpu_custom_call.1
= control target key start
LH: loop header
LB: loop body
LE: loop exit
PB: predicated region body
PF: predicated region fallthrough
CT: control target
= control target key end

     0   :  { %s2451_s0 = inlined_call_operand.vmem [shape: f32[6,16,32], index: 0, kind: input, shape index: {}]   ;;  %s2452_s1 = inlined_call_operand.vmem [shape: f32[1,32], index: 1, kind: input, shape index: {}]   ;;  %s2453_s2 = inlined_call_operand.vmem [shape: f32[1,32], index: 2, kind: input, shape index: {}]   ;;  %s2454_s3 = inlined_call_operand.vmem [shape: f32[16,64], index: 3, kind: input, shape index: {}]   ;;  %s2455_s4 = inlined_call_operand.vmem [shape: f32[1,64], index: 4, kind: input, shape index: {}]   ;;  %s2456_s5 = inlined_call_operand.vmem [shape: f32[64,16], index: 5, kind: input, shape index: {}]   ;;  %s2457_s6 = inlined_call_operand.vmem [shape: f32[1,16], index: 6, kind: input, shape index: {}]   ;;  %s2458_s7 = inlined_call_operand.vmem [shape: f32[1,32], index: 7, kind: input, shape index: {}]   ;;  %s2459_s8 = inlined_call_operand.vmem [shape: f32[1,32], index: 8, kind: input, shape index: {}]   ;;  %s2460_s9 = inlined_call_operand.vmem [shape: f32[32,128], index: 9, kind: input, shape index: {}]   ;;  %s2461_s10 = inlined_call_operand.vmem [shape: f32[1,128], index: 10, kind: input, shape index: {}]   ;;  %s2462_s11 = inlined_call_operand.vmem [shape: f32[128,32], index: 11, kind: input, shape index: {}]   ;;  %s2463_s12 = inlined_call_operand.vmem [shape: f32[1,32], index: 12, kind: input, shape index: {}]   ;;  %s2464_s13 = inlined_call_operand.hbm [shape: f32[6,16,32], index: 13, kind: output, shape index: {}]  }
   0x1   :  { %2465 = sst [smem:[#allocation5_spill]] %s2451_s0 }
   0x2   :  { %2466 = sst [smem:[#allocation6_spill]] %s2452_s1 }
   0x3   :  { %18 = vsyncpa [#allocation3], 0 }
   0x4   :  { %20 = vsyncpa [#allocation3 + $0x1], 0  ;;  %s2087_s25 = smov 0   ;;  %s2089_s26 = smov 0  }
   0x5   :  { %s2091_s27 = smov 0   ;;  %s2093_s28 = smov 0  }
   0x6 LB: > { %s2108_s29 = sadd.s32 4294967295, %s2012_s28   ;;  %s1591_s30 = sadd.s32 4294967294, %s2012_s28   ;;  %s2012_s28 = sphi %s2093_s28, %s2474_s28   ;;  %s2008_s27 = sphi %s2091_s27, %s2473_s27   ;;  %s2004_s26 = sphi %s2089_s26, %s2472_s26   ;;  %s2000_s25 = sphi %s2087_s25, %s2471_s25  }
   0x7   : > { %s2112_s14 = sadd.s32 1, %s2012_s28   ;;  %s311_s15 = sadd.s32 1, %s2008_s27 }
   0x8   : > { %s308_s16 = ssub.s32 %s2012_s28, %s2112_s14  ;;  %p321_p0 = scmp.ne.s32.totalorder %s2008_s27, %s2004_s26 }
   0x9   : > { %p309_p1 = scmp.eq.s32.totalorder %s308_s16, 0  ;;  %p322_p2 = scmp.eq.s32.totalorder %s2108_s29, 1 }
   0xa   : > { %p327_p3 = scmp.ne.s32.totalorder %s2004_s26, %s2000_s25  ;;  %p328_p4 = scmp.eq.s32.totalorder %s1591_s30, 1 }
   0xb   : > { %s2123_s17 = scalar_select %p309_p1, %s2008_s27, %s311_s15  }
   0xc   : > { %p2125_p5 = por %p322_p2, %p321_p0  ;;  %p2129_p6 = por %p328_p4, %p327_p3 }
   0xd   : > { %p1594_p7 = scmp.ge.s32.totalorder %s2012_s28, 1  ;;  %p392_p8 = scmp.lt.s32.totalorder %s2012_s28, 3 }
   0xf   : > { %p393_p9 = pnand %p1594_p7, %p392_p8 }
  0x10   : > { %s437_s20 = smul.u32 (!%p393_p9), 3, %s2108_s29  ;;  %vm453_vm0 = vcmask (!%p393_p9), 261120   ;;  %s2469_s0 = sld [smem:[#allocation5_spill]] (!%p393_p9)  ;;  %vm679_vm1 = vcmask (!%p393_p9), 130048   ;;  %vm868_vm2 = vcmask (!%p393_p9), 523264  }
  0x11   : > { %396 = sbr.rel (%p393_p9) target bundleno = 1543 (0x607), region = 72  ;;  %s2470_s1 = sld [smem:[#allocation6_spill]] (!%p393_p9) }
  0x12   : > { %p438_p10 = scmp.lt.s32.totalorder (!%p393_p9), %s437_s20, 5  ;;  %s1642_s15 = smul.u32 (!%p393_p9), 768, %s2108_s29 }
  0x13   : > { %s2014_s23 = smov (!%p393_p9), [#allocation2]  }
  0x18   : > { %s2476_s20 = smov (!%p438_p10, %s437_s20), 5 }
  0x19   : > { %s1639_s21 = sshll.u32 %s2476_s20, 4  ;;  %s2401_s20 = scalar_lea.hbm %s2464_s13, %s1642_s15 }
  0x1a   : > { %s442_s24 = scalar_lea.vmem %s2469_s0, %s1639_s21  ;;  %s434_s21 = sand.u32 1, %s2004_s26  }
  0x1b   : > { %v2139_v0 = vld [vmem:[%s442_s24] sm:$0xff]  ;;  %v2141_v1 = vld [vmem:[%s442_s24 + $0x8] sm:$0xff]  ;;  %v2152_v7 = vld [vmem:[%s442_s24 + $0x10] sm:$0xff]  ;;  %s1883_s22 = smul.u32 48, %s434_s21  ;;  %s2410_s29 = scalar_lea.sflag [#allocation3], %s434_s21 }
  0x1c   : > { %v454_v2 = vsel %vm453_vm0, %v2139_v0, 0.0  ;;  %v472_v3 = vmul.f32 %v2139_v0, %v2139_v0  ;;  %v473_v4 = vmul.f32 %v2141_v1, %v2141_v1  ;;  %v457_v6 = vsel %vm453_vm0, %v2141_v1, 0.0  ;;  %v2155_v9 = vld [vmem:[%s442_s24 + $0x18] sm:$0xff]  ;;  %v2166_v15 = vld [vmem:[%s442_s24 + $0x20] sm:$0xff]  ;;  %v2169_v17 = vld [vmem:[%s442_s24 + $0x28] sm:$0xff]  ;;  %s1954_s24 = sshll.u32 %s2014_s23, 4  ;;  %s1955_s24 = int_to_ptr.vmem [resolvable:$false] %s1954_s24 }
  0x1d   : > { %455 = vadd.xlane.f32.xlu0 %v454_v2  ;;  %v460_v10 = vsel %vm453_vm0, %v2152_v7, 0.0  ;;  %v474_v11 = vmul.f32 %v2152_v7, %v2152_v7  ;;  %v463_v12 = vsel %vm453_vm0, %v2155_v9, 0.0  ;;  %v475_v13 = vmul.f32 %v2155_v9, %v2155_v9  ;;  %s436_s30 = scalar_lea.vmem [#allocation2], %s1883_s22  ;;  %s1956_s15 = scalar_lea.vmem %s1955_s24, 1536 }
  0x1e   : > { %v478_v5 = vsel %vm453_vm0, %v472_v3, 0.0  ;;  %v481_v8 = vsel %vm453_vm0, %v473_v4, 0.0  ;;  %v466_v18 = vsel %vm453_vm0, %v2166_v15, 0.0  ;;  %v476_v19 = vmul.f32 %v2166_v15, %v2166_v15  ;;  %v1597_v3 = vld [vmem:[%s2470_s1] ss:$0 sm:$0xff]  ;;  %s1529_s0 = sshll.u32 %s436_s30, 4  ;;  %s2403_s0 = int_to_ptr.vmem [resolvable:$true] %s1529_s0 }
  0x1f   : > { %479 = vadd.xlane.f32.xlu1 %v478_v5  ;;  %v484_v14 = vsel %vm453_vm0, %v474_v11, 0.0  ;;  %v487_v16 = vsel %vm453_vm0, %v475_v13, 0.0  ;;  %v469_v20 = vsel %vm453_vm0, %v2169_v17, 0.0  ;;  %v477_v21 = vmul.f32 %v2169_v17, %v2169_v17  ;;  %v1598_v11 = vld [vmem:[%s2453_s2] ss:$0 sm:$0xff]  ;;  %s1950_s22 = scalar_lea.vmem %s2403_s0, 768  ;;  %p1957_p0 = scmp.lt.s32.totalorder %s2403_s0, %s1955_s24 }
  0x20   : > { %v490_v22 = vsel %vm453_vm0, %v476_v19, 0.0  ;;  %p1951_p11 = scmp.ne.s32.totalorder %s2403_s0, %s1950_s22  ;;  %p1958_p1 = scmp.lt.s32.totalorder %s1956_s15, %s1950_s22 }
  0x21   : > { %458 = vadd.xlane.f32.xlu0 %v457_v6  ;;  %v493_v23 = vsel %vm453_vm0, %v477_v21, 0.0  ;;  %v670_v21 = vld [vmem:[%s2454_s3] sm:$0xff] }
  0x22   : > { %p1952_p12 = pnand %p1951_p11, %p2125_p5  ;;  %p1959_p2 = por %p1958_p1, %p1957_p0 }
  0x23   : > { %482 = vadd.xlane.f32.xlu1 %v481_v8 }
  0x24   : > { %p1953_p13 = pneg %p1952_p12 }
  0x25   : > { %461 = vadd.xlane.f32.xlu0 %v460_v10 }
  0x26   : > { %p1960_p3 = pnand %p1959_p2, %p1953_p13 }
  0x27   : > { %464 = vadd.xlane.f32.xlu1 %v463_v12 }
  0x29   : > { %485 = vadd.xlane.f32.xlu0 %v484_v14 }
  0x2b   : > { %488 = vadd.xlane.f32.xlu1 %v487_v16 }
  0x2d   : > { %467 = vadd.xlane.f32.xlu0 %v466_v18 }
  0x2f   : > { %470 = vadd.xlane.f32.xlu1 %v469_v20 }
  0x31   : > { %491 = vadd.xlane.f32.xlu0 %v490_v22  ;;  %v671_v22 = vld [vmem:[%s2454_s3 + $0x8] sm:$0xff] }
  0x33   : > { %494 = vadd.xlane.f32.xlu1 %v493_v23 }
  0xaa   : > { %v456_v24 = vpop.xlane.xlu0 %455 }
  0xab   : > { %v496_v25 = vmul.f32 0.03125, %v456_v24 }
  0xac   : > { %v480_v26 = vpop.xlane.xlu1 %479 }
  0xad   : > { %v508_v27 = vmul.f32 %v496_v25, %v496_v25  ;;  %v502_v28 = vmul.f32 0.03125, %v480_v26  ;;  %v526_v59 = vsub.f32 %v2139_v0, %v496_v25  ;;  %v1823_v25 = vpack.c.bf16 %v671_v22, %v670_v21 }
  0xae   : > { %v459_v29 = vpop.xlane.xlu0 %458 }
  0xaf   : > { %v514_v30 = vsub.f32 %v502_v28, %v508_v27  ;;  %v497_v31 = vmul.f32 0.03125, %v459_v29  ;;  %1824 = vmatprep.subr.bf16.mxu0 %v1823_v25 }
  0xb0   : > { %v483_v32 = vpop.xlane.xlu1 %482  ;;  %1826 = vmatpush3.bf16.msra.mxu0 %v1823_v25 }
  0xb1   : > { %v520_v33 = vmax.f32 %v514_v30, 0.0  ;;  %v509_v34 = vmul.f32 %v497_v31, %v497_v31  ;;  %v503_v35 = vmul.f32 0.03125, %v483_v32  ;;  %v527_v12 = vsub.f32 %v2141_v1, %v497_v31 }
  0xb2   : > { %v462_v36 = vpop.xlane.xlu0 %461 }
  0xb3   : > { %v532_v37 = vadd.f32 1e-05, %v520_v33  ;;  %v515_v38 = vsub.f32 %v503_v35, %v509_v34  ;;  %v498_v39 = vmul.f32 0.03125, %v462_v36 }
  0xb4   : > { %v465_v40 = vpop.xlane.xlu1 %464 }
  0xb5   : > { %1926 = vrsqrt.f32 %v532_v37  ;;  %v521_v41 = vmax.f32 %v515_v38, 0.0  ;;  %v499_v42 = vmul.f32 0.03125, %v465_v40  ;;  %v510_v45 = vmul.f32 %v498_v39, %v498_v39 }
  0xb6   : > { %v486_v43 = vpop.xlane.xlu0 %485  ;;  %v528_v28 = vsub.f32 %v2152_v7, %v498_v39 }
  0xb7   : > { %v533_v44 = vadd.f32 1e-05, %v521_v41  ;;  %v504_v46 = vmul.f32 0.03125, %v486_v43  ;;  %v511_v47 = vmul.f32 %v499_v42, %v499_v42  ;;  %v529_v31 = vsub.f32 %v2155_v9, %v499_v42 }
  0xb8   : > { %v489_v48 = vpop.xlane.xlu1 %488 }
  0xb9   : > { %1928 = vrsqrt.f32 %v533_v44  ;;  %v516_v49 = vsub.f32 %v504_v46, %v510_v45  ;;  %v505_v50 = vmul.f32 0.03125, %v489_v48 }
  0xba   : > { %v468_v51 = vpop.xlane.xlu0 %467 }
  0xbb   : > { %v522_v52 = vmax.f32 %v516_v49, 0.0  ;;  %v517_v53 = vsub.f32 %v505_v50, %v511_v47  ;;  %v500_v54 = vmul.f32 0.03125, %v468_v51  ;;  %v853_v49 = vld [vmem:[%s2456_s5] sm:$0xff]  ;;  %v854_v50 = vld [vmem:[%s2456_s5 + $0x8] sm:$0xff]  ;;  %v855_v51 = vld [vmem:[%s2456_s5 + $0x10] sm:$0xff] }
  0xbc   : > { %v471_v55 = vpop.xlane.xlu1 %470 }
  0xbd   : > { %v534_v56 = vadd.f32 1e-05, %v522_v52  ;;  %v523_v57 = vmax.f32 %v517_v53, 0.0  ;;  %v512_v58 = vmul.f32 %v500_v54, %v500_v54  ;;  %v501_v60 = vmul.f32 0.03125, %v471_v55  ;;  %v856_v53 = vld [vmem:[%s2456_s5 + $0x18] sm:$0xff]  ;;  %v857_v55 = vld [vmem:[%s2456_s5 + $0x20] sm:$0xff] }
  0xbe   : > { %v492_v61 = vpop.xlane.xlu0 %491  ;;  %v530_v38 = vsub.f32 %v2166_v15, %v500_v54  ;;  %v1827_v52 = vpack.c.bf16 %v854_v50, %v853_v49  ;;  %v1831_v54 = vpack.c.bf16 %v856_v53, %v855_v51 }
  0xbf   : > { %v1927_v62 = vpop.eup %1926  ;;  %1930 = vrsqrt.f32 %v534_v56  ;;  %v535_v63 = vadd.f32 1e-05, %v523_v57  ;;  %v506_v2 = vmul.f32 0.03125, %v492_v61  ;;  %v513_v4 = vmul.f32 %v501_v60, %v501_v60  ;;  %v858_v56 = vld [vmem:[%s2456_s5 + $0x28] sm:$0xff] }
  0xc0   : > { %v495_v5 = vpop.xlane.xlu1 %494  ;;  %v544_v6 = vmul.f32 %v1927_v62, %v526_v59  ;;  %v531_v41 = vsub.f32 %v2169_v17, %v501_v60  ;;  %1828 = vmatprep.subr.bf16.mxu1 %v1827_v52  ;;  %v1835_v57 = vpack.c.bf16 %v858_v56, %v857_v55 }
  0xc1   : > { %1932 = vrsqrt.f32 %v535_v63  ;;  %v518_v8 = vsub.f32 %v506_v2, %v512_v58  ;;  %v507_v10 = vmul.f32 0.03125, %v495_v5  ;;  %1830 = vmatpush3.bf16.msra.mxu1 %v1827_v52  ;;  %v1612_v52 = vld [vmem:[%s2457_s6] ss:$0 sm:$0xff] }
  0xc2   : > { %v556_v13 = vmul.f32 %v1597_v3, %v544_v6  ;;  %1832 = vmatprep.subr.bf16.mxu1 %v1831_v54 }
  0xc3   : > { %v1929_v14 = vpop.eup %1928  ;;  %v524_v16 = vmax.f32 %v518_v8, 0.0  ;;  %v519_v18 = vsub.f32 %v507_v10, %v513_v4  ;;  %v859_v10 = vld [vmem:[%s2456_s5 + $0x30] sm:$0xff] }
  0xc4   : > { %v568_v19 = vadd.f32 %v1598_v11, %v556_v13  ;;  %v545_v20 = vmul.f32 %v1929_v14, %v527_v12  ;;  %v1599_v13 = vld [vmem:[%s2455_s4] ss:$0 sm:$0xff] }
  0xc5   : > { %v536_v23 = vadd.f32 1e-05, %v524_v16  ;;  %v525_v24 = vmax.f32 %v519_v18, 0.0  ;;  %1834 = vmatpush3.bf16.msra.mxu1 %v1831_v54 }
  0xc6   : > { %574 = vxpose.xlu0.b32.start [1/2] (short) (narrow) %v568_v19, 32  ;;  %v557_v26 = vmul.f32 %v1597_v3, %v545_v20  ;;  %1836 = vmatprep.subr.bf16.mxu1 %v1835_v57 }
  0xc7   : > { %1934 = vrsqrt.f32 %v536_v23  ;;  %v537_v27 = vadd.f32 1e-05, %v525_v24 }
  0xc8   : > { %v569_v29 = vadd.f32 %v1598_v11, %v557_v26 }
  0xc9   : > { %v1931_v30 = vpop.eup %1930  ;;  %1936 = vrsqrt.f32 %v537_v27  ;;  %1838 = vmatpush3.bf16.msra.mxu1 %v1835_v57 }
  0xca   : > { %575 = vxpose.xlu0.b32.end [2/2] (short) (narrow) %v569_v29, 32  ;;  %v546_v32 = vmul.f32 %v1931_v30, %v528_v28 }
  0xcb   : > { %v1933_v33 = vpop.eup %1932 }
  0xcc   : > { %v558_v34 = vmul.f32 %v1597_v3, %v546_v32  ;;  %v547_v35 = vmul.f32 %v1933_v33, %v529_v31 }
  0xce   : > { %v570_v36 = vadd.f32 %v1598_v11, %v558_v34  ;;  %v559_v37 = vmul.f32 %v1597_v3, %v547_v35 }
  0xd0   : > { %606 = vxpose.xlu1.b32.start [1/2] (short) (narrow) %v570_v36, 32  ;;  %v571_v39 = vadd.f32 %v1598_v11, %v559_v37 }
  0xd1   : > { %v1935_v40 = vpop.eup %1934 }
  0xd2   : > { %v548_v43 = vmul.f32 %v1935_v40, %v530_v38 }
  0xd3   : > { %v1937_v44 = vpop.eup %1936 }
  0xd4   : > { %607 = vxpose.xlu1.b32.end [2/2] (short) (narrow) %v571_v39, 32  ;;  %v560_v45 = vmul.f32 %v1597_v3, %v548_v43  ;;  %v549_v46 = vmul.f32 %v1937_v44, %v531_v41 }
  0xd6   : > { %v572_v42 = vadd.f32 %v1598_v11, %v560_v45  ;;  %v561_v47 = vmul.f32 %v1597_v3, %v549_v46 }
  0xd8   : > { %638 = vxpose.xlu0.b32.start [1/2] (short) (narrow) %v572_v42, 32  ;;  %v573_v48 = vadd.f32 %v1598_v11, %v561_v47  ;;  %v860_v11 = vld [vmem:[%s2456_s5 + $0x38] sm:$0xff] }
  0xd9   : > { %v1839_v12 = vpack.c.bf16 %v860_v11, %v859_v10 }
  0xdb   : > { %1840 = vmatprep.subr.bf16.mxu1 %v1839_v12 }
  0xdc   : > { %639 = vxpose.xlu0.b32.end [2/2] (short) (narrow) %v573_v48, 32  ;;  %1842 = vmatpush3.bf16.msra.mxu1 %v1839_v12 }
 0x146   : > { %v590_v58 = vpop.trf.xlu0 }
 0x147   : > { %1713 = vmatprep.mubr.msk.f32.mxu0 %vm679_vm1, %v590_v58 }
 0x14a   : > { %v591_v59 = vpop.trf.xlu0 }
 0x14b   : > { %1714 = vmatmul.mubr.msk.f32.vlgmr.msra.gmra.mrb[0].mxu0 %vm679_vm1, %v591_v59 }
 0x14e   : > { %v592_v60 = vpop.trf.xlu0 }
 0x14f   : > { %1716 = vmatprep.mubr.msk.f32.mxu0 %vm679_vm1, %v592_v60 }
 0x150   : > { %v622_v61 = vpop.trf.xlu1 }
 0x152   : > { %v593_v62 = vpop.trf.xlu0 }
 0x153   : > { %1717 = vmatmul.mubr.msk.f32.gmra.mrb[2].mxu0 %vm679_vm1, %v593_v62 }
 0x154   : > { %v623_v63 = vpop.trf.xlu1  ;;  %1719 = vmatprep.mubr.msk.f32.mxu0 %vm679_vm1, %v622_v61 }
 0x157   : > { %1720 = vmatmul.mubr.msk.f32.gmra.mrb[4].mxu0 %vm679_vm1, %v623_v63 }
 0x158   : > { %v624_v2 = vpop.trf.xlu1  ;;  %v654_v3 = vpop.trf.xlu0 }
 0x159   : > { %1722 = vmatprep.mubr.msk.f32.mxu0 %vm679_vm1, %v624_v2 }
 0x15c   : > { %v625_v4 = vpop.trf.xlu1  ;;  %v655_v5 = vpop.trf.xlu0 }
 0x15d   : > { %1723 = vmatmul.mubr.msk.f32.gmra.mrb[6].mxu0 %vm679_vm1, %v625_v4 }
 0x15e   : > { %1725 = vmatprep.mubr.msk.f32.mxu0 %vm679_vm1, %v654_v3 }
 0x160   : > { %v656_v6 = vpop.trf.xlu0 }
 0x161   : > { %1726 = vmatmul.mubr.msk.f32.gmra.mrb[8].mxu0 %vm679_vm1, %v655_v5 }
 0x162   : > { %1728 = vmatprep.mubr.msk.f32.mxu0 %vm679_vm1, %v656_v6 }
 0x164   : > { %v657_v8 = vpop.trf.xlu0 }
 0x165   : > { %1729 = vmatmul.mubr.msk.f32.gmra.mrb[10].mxu0 %vm679_vm1, %v657_v8 }
 0x21e   : > { %v1715_v14 = vpop.f32.mrb[0].mxu0 }
 0x21f   : > { %v788_v16 = vadd.f32 %v1715_v14, %v1599_v13  ;;  %v782_v18 = vpop.f32.mrb[1].mxu0 }
 0x220   : > { %v783_v19 = vadd.f32 %v1599_v13, %v782_v18 }
 0x221   : > { %v842_v20 = vmax.f32 %v788_v16, 0.0 }
 0x222   : > { %v841_v21 = vmax.f32 %v783_v19, 0.0 }
 0x224   : > { %1747 = vmatprep.mubr.msk.f32.mxu1 %vm868_vm2, %v841_v21 }
 0x225   : > { %1748 = vmatmul.mubr.msk.f32.vlgmr.msra.gmra.mrb[0].mxu1 %vm868_vm2, %v842_v20 }
 0x226   : > { %v1718_v22 = vpop.f32.mrb[2].mxu0 }
 0x227   : > { %v798_v23 = vadd.f32 %v1718_v22, %v1599_v13  ;;  %v792_v24 = vpop.f32.mrb[3].mxu0 }
 0x228   : > { %v793_v25 = vadd.f32 %v1599_v13, %v792_v24 }
 0x229   : > { %v844_v26 = vmax.f32 %v798_v23, 0.0 }
 0x22a   : > { %v843_v27 = vmax.f32 %v793_v25, 0.0  ;;  %v1721_v28 = vpop.f32.mrb[4].mxu0 }
 0x22b   : > { %v808_v29 = vadd.f32 %v1721_v28, %v1599_v13  ;;  %v802_v30 = vpop.f32.mrb[5].mxu0 }
 0x22c   : > { %v803_v31 = vadd.f32 %v1599_v13, %v802_v30  ;;  %1750 = vmatprep.mubr.msk.f32.mxu1 %vm868_vm2, %v843_v27 }
 0x22d   : > { %1751 = vmatmul.mubr.msk.f32.gmra.mrb[2].mxu1 %vm868_vm2, %v844_v26  ;;  %v846_v33 = vmax.f32 %v808_v29, 0.0 }
 0x22e   : > { %v845_v32 = vmax.f32 %v803_v31, 0.0 }
 0x230   : > { %v1724_v34 = vpop.f32.mrb[6].mxu0  ;;  %1753 = vmatprep.mubr.msk.f32.mxu1 %vm868_vm2, %v845_v32 }
 0x231   : > { %v818_v35 = vadd.f32 %v1724_v34, %v1599_v13  ;;  %v812_v36 = vpop.f32.mrb[7].mxu0  ;;  %1754 = vmatmul.mubr.msk.f32.gmra.mrb[4].mxu1 %vm868_vm2, %v846_v33 }
 0x232   : > { %v813_v37 = vadd.f32 %v1599_v13, %v812_v36 }
 0x233   : > { %v848_v41 = vmax.f32 %v818_v35, 0.0 }
 0x234   : > { %v847_v38 = vmax.f32 %v813_v37, 0.0  ;;  %v1727_v40 = vpop.f32.mrb[8].mxu0 }
 0x235   : > { %v828_v39 = vadd.f32 %v1727_v40, %v1599_v13  ;;  %v822_v43 = vpop.f32.mrb[9].mxu0 }
 0x236   : > { %v823_v44 = vadd.f32 %v1599_v13, %v822_v43  ;;  %1756 = vmatprep.mubr.msk.f32.mxu1 %vm868_vm2, %v847_v38 }
 0x237   : > { %1757 = vmatmul.mubr.msk.f32.gmra.mrb[6].mxu1 %vm868_vm2, %v848_v41  ;;  %v850_v42 = vmax.f32 %v828_v39, 0.0 }
 0x238   : > { %v849_v45 = vmax.f32 %v823_v44, 0.0  ;;  %v1730_v46 = vpop.f32.mrb[10].mxu0 }
 0x239   : > { %v838_v47 = vadd.f32 %v1730_v46, %v1599_v13  ;;  %v832_v48 = vpop.f32.mrb[11].mxu0 }
 0x23a   : > { %v833_v49 = vadd.f32 %v1599_v13, %v832_v48  ;;  %1759 = vmatprep.mubr.msk.f32.mxu1 %vm868_vm2, %v849_v45  ;;  %v1254_v45 = vld [vmem:[%s2460_s9] sm:$0xff] }
 0x23b   : > { %v852_v50 = vmax.f32 %v838_v47, 0.0  ;;  %1760 = vmatmul.mubr.msk.f32.gmra.mrb[8].mxu1 %vm868_vm2, %v850_v42  ;;  %v1256_v42 = vld [vmem:[%s2460_s9 + $0x10] sm:$0xff]  ;;  %v1257_v47 = vld [vmem:[%s2460_s9 + $0x18] sm:$0xff] }
 0x23c   : > { %v851_v51 = vmax.f32 %v833_v49, 0.0  ;;  %v1847_v48 = vpack.c.bf16 %v1257_v47, %v1256_v42  ;;  %v1384_v49 = vld [vmem:[%s2462_s11] sm:$0xff] }
 0x23e   : > { %1762 = vmatprep.mubr.msk.f32.mxu1 %vm868_vm2, %v851_v51  ;;  %v1386_v51 = vld [vmem:[%s2462_s11 + $0x10] sm:$0xff] }
 0x23f   : > { %1763 = vmatmul.mubr.msk.f32.gmra.mrb[10].mxu1 %vm868_vm2, %v852_v50  ;;  %v1385_v50 = vld [vmem:[%s2462_s11 + $0x8] sm:$0xff] }
 0x2f8   : > { %v1749_v53 = vpop.f32.mrb[0].mxu1 }
 0x2f9   : > { %v971_v54 = vpop.f32.mrb[1].mxu1  ;;  %v977_v56 = vadd.f32 %v1749_v53, %v1612_v52  ;;  %v1387_v53 = vld [vmem:[%s2462_s11 + $0x18] sm:$0xff] }
 0x2fa   : > { %v972_v55 = vadd.f32 %v1612_v52, %v971_v54  ;;  %v1855_v54 = vpack.c.bf16 %v1387_v53, %v1386_v51 }
 0x2fc   : > { %1030 = vxpose.xlu1.b32.start [1/4] (short) (narrow) %v972_v55, 16  ;;  %v1388_v55 = vld [vmem:[%s2462_s11 + $0x20] sm:$0xff] }
 0x300   : > { %1031 = vxpose.xlu1.b32.cont [2/4] (short) (narrow) %v977_v56, 16  ;;  %v1752_v57 = vpop.f32.mrb[2].mxu1  ;;  %v1389_v56 = vld [vmem:[%s2462_s11 + $0x28] sm:$0xff] }
 0x301   : > { %v981_v58 = vpop.f32.mrb[3].mxu1  ;;  %v987_v62 = vadd.f32 %v1752_v57, %v1612_v52  ;;  %v1859_v57 = vpack.c.bf16 %v1389_v56, %v1388_v55 }
 0x302   : > { %v982_v59 = vadd.f32 %v1612_v52, %v981_v58  ;;  %v1390_v58 = vld [vmem:[%s2462_s11 + $0x30] sm:$0xff] }
 0x304   : > { %v1755_v60 = vpop.f32.mrb[4].mxu1  ;;  %1032 = vxpose.xlu1.b32.cont [3/4] (short) (narrow) %v982_v59, 16  ;;  %v1391_v59 = vld [vmem:[%s2462_s11 + $0x38] sm:$0xff] }
 0x305   : > { %v991_v61 = vpop.f32.mrb[5].mxu1  ;;  %v997_v2 = vadd.f32 %v1755_v60, %v1612_v52  ;;  %v1863_v60 = vpack.c.bf16 %v1391_v59, %v1390_v58 }
 0x306   : > { %v992_v63 = vadd.f32 %v1612_v52, %v991_v61  ;;  %v1392_v61 = vld [vmem:[%s2462_s11 + $0x40] sm:$0xff] }
 0x308   : > { %1062 = vxpose.xlu0.b32.start [1/4] (short) (narrow) %v992_v63, 16  ;;  %1033 = vxpose.xlu1.b32.end [4/4] (short) (narrow) %v987_v62, 16  ;;  %v1393_v62 = vld [vmem:[%s2462_s11 + $0x48] sm:$0xff] }
 0x309   : > { %v1867_v63 = vpack.c.bf16 %v1393_v62, %v1392_v61 }
 0x30a   : > { %v1758_v3 = vpop.f32.mrb[6].mxu1 }
 0x30b   : > { %v1001_v4 = vpop.f32.mrb[7].mxu1  ;;  %v1007_v11 = vadd.f32 %v1758_v3, %v1612_v52  ;;  %v1395_v3 = vld [vmem:[%s2462_s11 + $0x58] sm:$0xff] }
 0x30c   : > { %1063 = vxpose.xlu0.b32.cont [2/4] (short) (narrow) %v997_v2, 16  ;;  %v1002_v5 = vadd.f32 %v1612_v52, %v1001_v4  ;;  %v1394_v2 = vld [vmem:[%s2462_s11 + $0x50] sm:$0xff] }
 0x30d   : > { %v1871_v4 = vpack.c.bf16 %v1395_v3, %v1394_v2 }
 0x30e   : > { %v1761_v6 = vpop.f32.mrb[8].mxu1 }
 0x30f   : > { %v1011_v8 = vpop.f32.mrb[9].mxu1  ;;  %v1017_v14 = vadd.f32 %v1761_v6, %v1612_v52  ;;  %v1397_v6 = vld [vmem:[%s2462_s11 + $0x68] sm:$0xff] }
 0x310   : > { %v1012_v10 = vadd.f32 %v1612_v52, %v1011_v8  ;;  %1064 = vxpose.xlu0.b32.cont [3/4] (short) (narrow) %v1002_v5, 16  ;;  %v1396_v5 = vld [vmem:[%s2462_s11 + $0x60] sm:$0xff] }
 0x311   : > { %v1875_v8 = vpack.c.bf16 %v1397_v6, %v1396_v5 }
 0x312   : > { %1094 = vxpose.xlu1.b32.start [1/4] (short) (narrow) %v1012_v10, 16  ;;  %v1764_v12 = vpop.f32.mrb[10].mxu1 }
 0x313   : > { %v1021_v13 = vpop.f32.mrb[11].mxu1  ;;  %v1027_v18 = vadd.f32 %v1764_v12, %v1612_v52 }
 0x314   : > { %1065 = vxpose.xlu0.b32.end [4/4] (short) (narrow) %v1007_v11, 16  ;;  %v1022_v16 = vadd.f32 %v1612_v52, %v1021_v13  ;;  %v1851_v52 = vpack.c.bf16 %v1385_v50, %v1384_v49  ;;  %v1626_v49 = vld [vmem:[%s2459_s8] ss:$0 sm:$0xff] }
 0x316   : > { %1095 = vxpose.xlu1.b32.cont [2/4] (short) (narrow) %v1017_v14, 16  ;;  %1852 = vmatprep.subr.bf16.mxu1 %v1851_v52 }
 0x317   : > { %1854 = vmatpush3.bf16.msra.mxu1 %v1851_v52 }
 0x318   : > { %1856 = vmatprep.subr.bf16.mxu1 %v1855_v54 }
 0x31a   : > { %1096 = vxpose.xlu1.b32.cont [3/4] (short) (narrow) %v1022_v16, 16 }
 0x31b   : > { %1858 = vmatpush3.bf16.msra.mxu1 %v1855_v54 }
 0x31c   : > { %1860 = vmatprep.subr.bf16.mxu1 %v1859_v57 }
 0x31e   : > { %1097 = vxpose.xlu1.b32.end [4/4] (short) (narrow) %v1027_v18, 16 }
 0x31f   : > { %1862 = vmatpush3.bf16.msra.mxu1 %v1859_v57 }
 0x320   : > { %1864 = vmatprep.subr.bf16.mxu1 %v1863_v60 }
 0x323   : > { %1866 = vmatpush3.bf16.msra.mxu1 %v1863_v60 }
 0x324   : > { %1868 = vmatprep.subr.bf16.mxu1 %v1867_v63 }
 0x327   : > { %1870 = vmatpush3.bf16.msra.mxu1 %v1867_v63 }
 0x328   : > { %1872 = vmatprep.subr.bf16.mxu1 %v1871_v4 }
 0x32b   : > { %1874 = vmatpush3.bf16.msra.mxu1 %v1871_v4 }
 0x32c   : > { %1876 = vmatprep.subr.bf16.mxu1 %v1875_v8 }
 0x32f   : > { %1878 = vmatpush3.bf16.msra.mxu1 %v1875_v8 }
 0x37c   : > { %v1046_v19 = vpop.trf.xlu1 }
 0x37d   : > { %v2254_v20 = vadd.f32 %v1046_v19, %v2139_v0 }
 0x37f   : > { %v1134_v21 = vsel %vm453_vm0, %v2254_v20, 0.0  ;;  %v1152_v22 = vmul.f32 %v2254_v20, %v2254_v20 }
 0x380   : > { %1135 = vadd.xlane.f32.xlu0 %v1134_v21  ;;  %v1047_v23 = vpop.trf.xlu1 }
 0x381   : > { %v2261_v24 = vadd.f32 %v1047_v23, %v2141_v1  ;;  %v1158_v25 = vsel %vm453_vm0, %v1152_v22, 0.0 }
 0x383   : > { %v1137_v26 = vsel %vm453_vm0, %v2261_v24, 0.0  ;;  %v1153_v0 = vmul.f32 %v2261_v24, %v2261_v24 }
 0x384   : > { %1159 = vadd.xlane.f32.xlu0 %v1158_v25  ;;  %1138 = vadd.xlane.f32.xlu1 %v1137_v26 }
 0x385   : > { %v1161_v27 = vsel %vm453_vm0, %v1153_v0, 0.0 }
 0x388   : > { %1162 = vadd.xlane.f32.xlu1 %v1161_v27  ;;  %v1078_v28 = vpop.trf.xlu0 }
 0x389   : > { %v2270_v29 = vadd.f32 %v1078_v28, %v2152_v7 }
 0x38b   : > { %v1140_v1 = vsel %vm453_vm0, %v2270_v29, 0.0  ;;  %v1154_v30 = vmul.f32 %v2270_v29, %v2270_v29 }
 0x38c   : > { %1141 = vadd.xlane.f32.xlu0 %v1140_v1  ;;  %v1079_v31 = vpop.trf.xlu0 }
 0x38d   : > { %v2277_v32 = vadd.f32 %v1079_v31, %v2155_v9  ;;  %v1164_v33 = vsel %vm453_vm0, %v1154_v30, 0.0 }
 0x38f   : > { %v1143_v34 = vsel %vm453_vm0, %v2277_v32, 0.0  ;;  %v1155_v7 = vmul.f32 %v2277_v32, %v2277_v32 }
 0x390   : > { %1165 = vadd.xlane.f32.xlu0 %v1164_v33  ;;  %1144 = vadd.xlane.f32.xlu1 %v1143_v34 }
 0x391   : > { %v1167_v35 = vsel %vm453_vm0, %v1155_v7, 0.0 }
 0x392   : > { %v1110_v36 = vpop.trf.xlu1 }
 0x393   : > { %v2286_v37 = vadd.f32 %v1110_v36, %v2166_v15 }
 0x394   : > { %1168 = vadd.xlane.f32.xlu1 %v1167_v35 }
 0x395   : > { %v1146_v9 = vsel %vm453_vm0, %v2286_v37, 0.0  ;;  %v1156_v38 = vmul.f32 %v2286_v37, %v2286_v37 }
 0x396   : > { %v1111_v40 = vpop.trf.xlu1  ;;  %1147 = vadd.xlane.f32.xlu0 %v1146_v9 }
 0x397   : > { %v2293_v41 = vadd.f32 %v1111_v40, %v2169_v17  ;;  %v1170_v39 = vsel %vm453_vm0, %v1156_v38, 0.0  ;;  %v1255_v17 = vld [vmem:[%s2460_s9 + $0x8] sm:$0xff] }
 0x398   : > { %v1843_v46 = vpack.c.bf16 %v1255_v17, %v1254_v45  ;;  %v1625_v45 = vld [vmem:[%s2458_s7] ss:$0 sm:$0xff] }
 0x399   : > { %v1149_v43 = vsel %vm453_vm0, %v2293_v41, 0.0  ;;  %v1157_v15 = vmul.f32 %v2293_v41, %v2293_v41 }
 0x39a   : > { %1171 = vadd.xlane.f32.xlu0 %v1170_v39  ;;  %1150 = vadd.xlane.f32.xlu1 %v1149_v43 }
 0x39b   : > { %v1173_v44 = vsel %vm453_vm0, %v1157_v15, 0.0  ;;  %1844 = vmatprep.subr.bf16.mxu0 %v1843_v46 }
 0x39c   : > { %1846 = vmatpush3.bf16.msra.mxu0 %v1843_v46 }
 0x39d   : > { %1848 = vmatprep.subr.bf16.mxu0 %v1847_v48 }
 0x39e   : > { %1174 = vadd.xlane.f32.xlu1 %v1173_v44 }
 0x3a0   : > { %1850 = vmatpush3.bf16.msra.mxu0 %v1847_v48 }
 0x40d   : > { %v1136_v10 = vpop.xlane.xlu0 %1135 }
 0x40e   : > { %v1176_v11 = vmul.f32 0.03125, %v1136_v10 }
 0x410   : > { %v1188_v12 = vmul.f32 %v1176_v11, %v1176_v11  ;;  %v1206_v43 = vsub.f32 %v2254_v20, %v1176_v11 }
 0x411   : > { %v1139_v13 = vpop.xlane.xlu1 %1138  ;;  %v1160_v14 = vpop.xlane.xlu0 %1159 }
 0x412   : > { %v1177_v16 = vmul.f32 0.03125, %v1139_v13  ;;  %v1182_v18 = vmul.f32 0.03125, %v1160_v14 }
 0x414   : > { %v1189_v19 = vmul.f32 %v1177_v16, %v1177_v16  ;;  %v1194_v21 = vsub.f32 %v1182_v18, %v1188_v12  ;;  %v1207_v50 = vsub.f32 %v2261_v24, %v1177_v16 }
 0x415   : > { %v1163_v22 = vpop.xlane.xlu1 %1162 }
 0x416   : > { %v1200_v23 = vmax.f32 %v1194_v21, 0.0  ;;  %v1183_v25 = vmul.f32 0.03125, %v1163_v22 }
 0x418   : > { %v1212_v26 = vadd.f32 1e-05, %v1200_v23  ;;  %v1195_v0 = vsub.f32 %v1183_v25, %v1189_v19 }
 0x419   : > { %v1142_v27 = vpop.xlane.xlu0 %1141 }
 0x41a   : > { %1938 = vrsqrt.f32 %v1212_v26  ;;  %v1201_v28 = vmax.f32 %v1195_v0, 0.0  ;;  %v1178_v1 = vmul.f32 0.03125, %v1142_v27 }
 0x41c   : > { %v1213_v30 = vadd.f32 1e-05, %v1201_v28  ;;  %v1190_v31 = vmul.f32 %v1178_v1, %v1178_v1  ;;  %v1208_v10 = vsub.f32 %v2270_v29, %v1178_v1 }
 0x41d   : > { %v1145_v33 = vpop.xlane.xlu1 %1144  ;;  %v1166_v34 = vpop.xlane.xlu0 %1165 }
 0x41e   : > { %1940 = vrsqrt.f32 %v1213_v30  ;;  %v1179_v7 = vmul.f32 0.03125, %v1145_v33  ;;  %v1184_v35 = vmul.f32 0.03125, %v1166_v34 }
 0x420   : > { %v1191_v36 = vmul.f32 %v1179_v7, %v1179_v7  ;;  %v1196_v9 = vsub.f32 %v1184_v35, %v1190_v31  ;;  %v1209_v16 = vsub.f32 %v2277_v32, %v1179_v7  ;;  %v1398_v35 = vld [vmem:[%s2462_s11 + $0x70] sm:$0xff] }
 0x421   : > { %v1169_v38 = vpop.xlane.xlu1 %1168 }
 0x422   : > { %v1202_v40 = vmax.f32 %v1196_v9, 0.0  ;;  %v1185_v39 = vmul.f32 0.03125, %v1169_v38  ;;  %v1627_v38 = vld [vmem:[%s2461_s10] ss:$0 sm:$0xff] }
 0x423   : > { %v1148_v15 = vpop.xlane.xlu0 %1147 }
 0x424   : > { %v1939_v44 = vpop.eup %1938  ;;  %v1214_v17 = vadd.f32 1e-05, %v1202_v40  ;;  %v1197_v46 = vsub.f32 %v1185_v39, %v1191_v36  ;;  %v1180_v42 = vmul.f32 0.03125, %v1148_v15  ;;  %v1399_v36 = vld [vmem:[%s2462_s11 + $0x78] sm:$0xff] }
 0x425   : > { %v1224_v47 = vmul.f32 %v1939_v44, %v1206_v43  ;;  %v1879_v9 = vpack.c.bf16 %v1399_v36, %v1398_v35 }
 0x426   : > { %1942 = vrsqrt.f32 %v1214_v17  ;;  %v1203_v48 = vmax.f32 %v1197_v46, 0.0  ;;  %v1192_v56 = vmul.f32 %v1180_v42, %v1180_v42  ;;  %v1210_v25 = vsub.f32 %v2286_v37, %v1180_v42 }
 0x427   : > { %v1151_v51 = vpop.xlane.xlu1 %1150  ;;  %v1172_v52 = vpop.xlane.xlu0 %1171  ;;  %v1236_v53 = vmul.f32 %v1625_v45, %v1224_v47  ;;  %1880 = vmatprep.subr.bf16.mxu1 %v1879_v9 }
 0x428   : > { %v1941_v54 = vpop.eup %1940  ;;  %v1215_v55 = vadd.f32 1e-05, %v1203_v48  ;;  %v1181_v57 = vmul.f32 0.03125, %v1151_v51  ;;  %v1186_v58 = vmul.f32 0.03125, %v1172_v52  ;;  %1882 = vmatpush3.bf16.msra.mxu1 %v1879_v9 }
 0x429   : > { %v1225_v59 = vmul.f32 %v1941_v54, %v1207_v50  ;;  %v1248_v60 = vadd.f32 %v1626_v49, %v1236_v53 }
 0x42a   : > { %1944 = vrsqrt.f32 %v1215_v55  ;;  %v1198_v61 = vsub.f32 %v1186_v58, %v1192_v56  ;;  %v1193_v2 = vmul.f32 %v1181_v57, %v1181_v57  ;;  %v1211_v28 = vsub.f32 %v2293_v41, %v1181_v57  ;;  %v1634_v56 = vld [vmem:[%s2463_s12] ss:$0 sm:$0xff] }
 0x42b   : > { %v1237_v62 = vmul.f32 %v1625_v45, %v1225_v59  ;;  %v1175_v63 = vpop.xlane.xlu1 %1174  ;;  %1773 = vmatprep.mubr.msk.f32.mxu0 %vm453_vm0, %v1248_v60 }
 0x42c   : > { %v1204_v3 = vmax.f32 %v1198_v61, 0.0  ;;  %v1187_v4 = vmul.f32 0.03125, %v1175_v63 }
 0x42d   : > { %v1249_v5 = vadd.f32 %v1626_v49, %v1237_v62 }
 0x42e   : > { %v1216_v6 = vadd.f32 1e-05, %v1204_v3  ;;  %v1199_v8 = vsub.f32 %v1187_v4, %v1193_v2 }
 0x42f   : > { %1774 = vmatmul.mubr.msk.f32.vlgmr.msra.gmra.mrb[12].mxu0 %vm453_vm0, %v1249_v5 }
 0x430   : > { %v1943_v11 = vpop.eup %1942  ;;  %1946 = vrsqrt.f32 %v1216_v6  ;;  %v1205_v12 = vmax.f32 %v1199_v8, 0.0 }
 0x431   : > { %v1226_v13 = vmul.f32 %v1943_v11, %v1208_v10 }
 0x432   : > { %v1217_v14 = vadd.f32 1e-05, %v1205_v12 }
 0x433   : > { %v1238_v18 = vmul.f32 %v1625_v45, %v1226_v13 }
 0x434   : > { %v1945_v19 = vpop.eup %1944  ;;  %1948 = vrsqrt.f32 %v1217_v14 }
 0x435   : > { %v1250_v21 = vadd.f32 %v1626_v49, %v1238_v18  ;;  %v1227_v22 = vmul.f32 %v1945_v19, %v1209_v16 }
 0x437   : > { %1776 = vmatprep.mubr.msk.f32.mxu0 %vm453_vm0, %v1250_v21  ;;  %v1239_v23 = vmul.f32 %v1625_v45, %v1227_v22 }
 0x439   : > { %v1251_v26 = vadd.f32 %v1626_v49, %v1239_v23 }
 0x43a   : > { %v1947_v0 = vpop.eup %1946 }
 0x43b   : > { %1777 = vmatmul.mubr.msk.f32.gmra.mrb[14].mxu0 %vm453_vm0, %v1251_v26  ;;  %v1228_v27 = vmul.f32 %v1947_v0, %v1210_v25 }
 0x43d   : > { %v1240_v1 = vmul.f32 %v1625_v45, %v1228_v27 }
 0x43e   : > { %v1949_v30 = vpop.eup %1948 }
 0x43f   : > { %v1252_v31 = vadd.f32 %v1626_v49, %v1240_v1  ;;  %v1229_v33 = vmul.f32 %v1949_v30, %v1211_v28 }
 0x441   : > { %1779 = vmatprep.mubr.msk.f32.mxu0 %vm453_vm0, %v1252_v31  ;;  %v1241_v34 = vmul.f32 %v1625_v45, %v1229_v33 }
 0x443   : > { %v1253_v7 = vadd.f32 %v1626_v49, %v1241_v34 }
 0x445   : > { %1780 = vmatmul.mubr.msk.f32.gmra.mrb[16].mxu0 %vm453_vm0, %v1253_v7 }
 0x502   : > { %v1775_v40 = vpop.f32.mrb[12].mxu0 }
 0x503   : > { %v1355_v39 = vadd.f32 %v1775_v40, %v1627_v38  ;;  %v1349_v43 = vpop.f32.mrb[13].mxu0 }
 0x504   : > { %v1350_v15 = vadd.f32 %v1627_v38, %v1349_v43 }
 0x505   : > { %v1379_v45 = vmax.f32 %v1355_v39, 0.0 }
 0x506   : > { %v1378_v44 = vmax.f32 %v1350_v15, 0.0 }
 0x508   : > { %1814 = vmatprep.mubr.f32.mxu1 %v1378_v44 }
 0x509   : > { %1815 = vmatmul.mubr.f32.vlgmr.msra.gmra.mrb[12].mxu1 %v1379_v45 }
 0x50e   : > { %v1778_v17 = vpop.f32.mrb[14].mxu0 }
 0x50f   : > { %v1365_v46 = vadd.f32 %v1778_v17, %v1627_v38  ;;  %v1359_v42 = vpop.f32.mrb[15].mxu0 }
 0x510   : > { %v1360_v47 = vadd.f32 %v1627_v38, %v1359_v42 }
 0x511   : > { %v1381_v49 = vmax.f32 %v1365_v46, 0.0 }
 0x512   : > { %v1380_v48 = vmax.f32 %v1360_v47, 0.0 }
 0x514   : > { %1817 = vmatprep.mubr.f32.mxu1 %v1380_v48 }
 0x515   : > { %1818 = vmatmul.mubr.f32.gmra.mrb[14].mxu1 %v1381_v49 }
 0x518   : > { %v1781_v50 = vpop.f32.mrb[16].mxu0 }
 0x519   : > { %v1375_v51 = vadd.f32 %v1781_v50, %v1627_v38  ;;  %v1369_v52 = vpop.f32.mrb[17].mxu0 }
 0x51a   : > { %v1370_v53 = vadd.f32 %v1627_v38, %v1369_v52 }
 0x51b   : > { %v1383_v55 = vmax.f32 %v1375_v51, 0.0 }
 0x51c   : > { %v1382_v54 = vmax.f32 %v1370_v53, 0.0 }
 0x51e   : > { %1820 = vmatprep.mubr.f32.mxu1 %v1382_v54 }
 0x51f   : > { %1821 = vmatmul.mubr.f32.gmra.mrb[16].mxu1 %v1383_v55 }
 0x5dc   : > { %v1816_v57 = vpop.f32.mrb[12].mxu1 }
 0x5dd   : > { %v1479_v58 = vadd.f32 %v1816_v57, %v1634_v56  ;;  %v1473_v59 = vpop.f32.mrb[13].mxu1 }
 0x5de   : > { %v1474_v60 = vadd.f32 %v1634_v56, %v1473_v59 }
 0x5df   : > { %v1503_v61 = vadd.f32 %v1479_v58, %v2261_v24 }
 0x5e0   : > { %v1502_v62 = vadd.f32 %v1474_v60, %v2254_v20 }
 0x5e1   : > { %1509 = vst.msk [vmem:[%s436_s30 + $0x8] sm:$0xff] %vm453_vm0, %v1503_v61 }
 0x5e2   : > { %1508 = vst.msk [vmem:[%s436_s30] sm:$0xff] %vm453_vm0, %v1502_v62 }
 0x5e8   : > { %v1819_v63 = vpop.f32.mrb[14].mxu1 }
 0x5e9   : > { %v1489_v2 = vadd.f32 %v1819_v63, %v1634_v56  ;;  %v1483_v3 = vpop.f32.mrb[15].mxu1 }
 0x5ea   : > { %v1484_v4 = vadd.f32 %v1634_v56, %v1483_v3 }
 0x5eb   : > { %v1505_v5 = vadd.f32 %v1489_v2, %v2277_v32 }
 0x5ec   : > { %v1504_v6 = vadd.f32 %v1484_v4, %v2270_v29 }
 0x5ed   : > { %1511 = vst.msk [vmem:[%s436_s30 + $0x18] sm:$0xff] %vm453_vm0, %v1505_v5 }
 0x5ee   : > { %1510 = vst.msk [vmem:[%s436_s30 + $0x10] sm:$0xff] %vm453_vm0, %v1504_v6 }
 0x5f2   : > { %v1822_v20 = vpop.f32.mrb[16].mxu1 }
 0x5f3   : > { %v1499_v24 = vadd.f32 %v1822_v20, %v1634_v56  ;;  %v1493_v8 = vpop.f32.mrb[17].mxu1 }
 0x5f4   : > { %v1494_v10 = vadd.f32 %v1634_v56, %v1493_v8 }
 0x5f5   : > { %v1507_v11 = vadd.f32 %v1499_v24, %v2293_v41 }
 0x5f6   : > { %v1506_v29 = vadd.f32 %v1494_v10, %v2286_v37 }
 0x5f7   : > { %1513 = vst.msk [vmem:[%s436_s30 + $0x28] sm:$0xff] %vm453_vm0, %v1507_v11 }
 0x5f8   : > { %1512 = vst.msk [vmem:[%s436_s30 + $0x20] sm:$0xff] %vm453_vm0, %v1506_v29 }
 0x5f9   : > { %1963 = shalt.err (!%p1960_p3)
}
 0x5fa   : > { %s1964_s21 = scalar_lea.hbm %s2401_s20, 768  ;;  %s1968_s16 = scalar_lea.hbm %s2464_s13, 1536 }
 0x5fb   : > { %p1965_p4 = scmp.ne.s32.totalorder %s2401_s20, %s1964_s21  ;;  %p1969_p9 = scmp.lt.u32.totalorder %s2401_s20, %s2464_s13 }
 0x5fc   : > { %p1970_p10 = scmp.lt.u32.totalorder %s1968_s16, %s1964_s21  ;;  %p1972_p12 = scmp.lt.u32.totalorder %s1964_s21, %s2401_s20 }
 0x5fd   : > { %p1966_p7 = pnand %p1965_p4, %p2125_p5 }
 0x5fe   : > { %p1971_p11 = por %p1970_p10, %p1969_p9 }
 0x5ff   : > { %p1967_p8 = pneg %p1966_p7 }
 0x600   : > { %p1973_p13 = por %p1972_p12, %p1971_p11 }
 0x602   : > { %p1974_p0 = pnand %p1973_p13, %p1967_p8 }
 0x604   : > { %1977 = shalt.err (!%p1974_p0)
}
 0x605   : > { %s2015_s22 = smov 128   ;;  %s2016_s15 = smov 8  }
 0x606   : > { %1884 = dma.vmem_to_hbm [thread:$0]  (%p2125_p5), %s2403_s0, 768, %s2401_s20, %s2410_s29, %s2015_s22, %s2015_s22, %s2016_s15  }
 0x607 PF: > { %p1890_p1 = scmp.ge.s32.totalorder %s2012_s28, 2  ;;  %s1544_s30 = sand.u32 1, %s2000_s25  }
 0x608   : > { %s1545_s21 = scalar_lea.sflag [#allocation3], %s1544_s30 }
 0x609   : > { %p1887_p2 = pnand %p1890_p1, %p2129_p6 }
 0x60b   : > { %1995 = dma.done.wait (!%p1887_p2), %s1545_s21, 768  }
 0x60c   : > { %1997 = vsyncadd (!%p1887_p2), %s1545_s21, 4294966528  ;;  %p23_p3 = scmp.ge.s32.totalorder %s2112_s14, 4   ;;  %s2471_s25 = smov %s2004_s26 }
 0x60d   : > { %s2472_s26 = smov %s2008_s27  ;;  %s2473_s27 = smov %s2123_s17 }
 0x60e   : > { %s2474_s28 = smov %s2112_s14  ;;  %25 = sbr.rel (!%p23_p3) target bundleno = 6 (0x6), region = 107 }
 0x615   :  { %1550 = vsyncpa [#allocation3], 1 }
 0x616   :  { %1552 = vsyncpa [#allocation3 + $0x1], 1 }

</bundles_post_ra>
